<compile_context>
chip_gen: v5e
topology: v5e:2x2
jax: 0.10.0
libtpu: 0.0.40
codegen_flags: <defaults>
</compile_context>

<pallas_src>
import functools

import jax
import jax.numpy as jnp
from jax.experimental import pallas as pl
from jax.experimental.pallas import tpu as pltpu


def _round_up(n: int, m: int) -> int:
    return ((n + m - 1) // m) * m


def _net_kernel(x_ref, m1_ref, m2_ref, w1_ref, b1_ref, w2_ref, b2_ref, o_ref):
    """One batch tile of the full MLP forward pass.

    x_ref : (TB, D)   bf16      m1_ref: (TB, H1) f32  (pre-scaled keep mask)
    w1_ref: (D, H1)   bf16      m2_ref: (TB, H2) f32  (pre-scaled keep mask)
    b1_ref: (1, H1)   f32
    w2_ref: (H1, H2)  bf16
    b2_ref: (1, H2)   f32
    o_ref : (TB, H2)  f32
    """
    # fc1 + ReLU  (bf16 x bf16 -> f32 accumulate on the MXU)
    h1 = jnp.dot(x_ref[...], w1_ref[...], preferred_element_type=jnp.float32)
    h1 = jnp.maximum(h1 + b1_ref[...], 0.0)
    # dropout1: mask already scaled to {0, 1/(1-p1)} -> single VPU multiply
    h1 = h1 * m1_ref[...]

    # fc2 + ReLU
    h2 = jnp.dot(h1.astype(jnp.bfloat16), w2_ref[...],
                 preferred_element_type=jnp.float32)
    h2 = jnp.maximum(h2 + b2_ref[...], 0.0)
    h2 = h2 * m2_ref[...]

    # Reference quirk reproduced: fc2 applied AGAIN (fc3 unused), then ReLU.
    out = jnp.dot(h2.astype(jnp.bfloat16), w2_ref[...],
                  preferred_element_type=jnp.float32)
    out = jnp.maximum(out + b2_ref[...], 0.0)
    o_ref[...] = out.astype(o_ref.dtype)


def _make_dropout_mask(key, shape, p, is_train):
    """Inverted-dropout keep mask (uniform(0,1) > p), pre-scaled by 1/(1-p)."""
    if (not is_train) or p == 0.0:
        return jnp.ones(shape, jnp.float32)
    if p == 1.0:
        return jnp.zeros(shape, jnp.float32)
    keep = (jax.random.uniform(key, shape, jnp.float32) > p).astype(jnp.float32)
    return keep * (1.0 / (1.0 - p))


@functools.partial(
    jax.jit, static_argnames=("dropout1", "dropout2", "is_train", "batch_tile"))
def net_forward(x, w1, b1, w2, b2, key, *,
                dropout1, dropout2, is_train=True, batch_tile=512):
    """Fused MLP forward in a single batch-gridded Pallas kernel.

    x  : (B, num_inputs)              f32
    w1 : (num_inputs, num_hiddens1)   f32  (already transposed to (in, out))
    b1 : (1, num_hiddens1)            f32
    w2 : (num_hiddens1, num_hiddens2) f32  (already transposed)
    b2 : (1, num_hiddens2)            f32
    key: jax PRNG key for the dropout masks
    """
    B, D = x.shape
    H1 = w1.shape[1]
    H2 = w2.shape[1]
    # fc2 is applied twice in the reference forward(); this only types if H1 == H2.
    assert H1 == H2, "reference forward applies fc2 twice; requires num_hiddens1 == num_hiddens2"
    assert b1.shape == (1, H1) and b2.shape == (1, H2)

    p1, p2 = float(dropout1), float(dropout2)
    k1, k2 = jax.random.split(key)
    m1 = _make_dropout_mask(k1, (B, H1), p1, bool(is_train))
    m2 = _make_dropout_mask(k2, (B, H2), p2, bool(is_train))

    # Batch tiling: TB is a multiple of 8 sublanes; pad B so the grid divides evenly.
    tb = min(_round_up(int(batch_tile), 8), _round_up(B, 8))
    bp = _round_up(B, tb)
    pad = bp - B
    if pad:
        x = jnp.pad(x, ((0, pad), (0, 0)))
        m1 = jnp.pad(m1, ((0, pad), (0, 0)))
        m2 = jnp.pad(m2, ((0, pad), (0, 0)))
    grid = (bp // tb,)

    # bf16 operands for the MXU; f32 accumulation happens inside the kernel.
    x16 = x.astype(jnp.bfloat16)
    w1_16 = w1.astype(jnp.bfloat16)
    w2_16 = w2.astype(jnp.bfloat16)
    b1f = b1.astype(jnp.float32)
    b2f = b2.astype(jnp.float32)

    # Advisory cost estimate for XLA scheduling around the fused kernel.
    flops = 2 * bp * (D * H1 + H1 * H2 + H2 * H2)
    bytes_accessed = (bp * D * 2 + bp * (H1 + H2) * 4 + bp * H2 * 4
                      + (D * H1 + H1 * H2) * 2 + (H1 + H2) * 4)
    cost = pl.CostEstimate(flops=flops, transcendentals=0,
                           bytes_accessed=bytes_accessed)

    # Resident weights + double-buffered batch tiles; only raise the scoped VMEM
    # limit above the default when the footprint actually needs it.
    tile_bytes = tb * D * 2 + tb * (H1 + H2) * 4 + tb * H2 * 4
    weight_bytes = (D * H1 + H1 * H2) * 2 + (H1 + H2) * 4
    scratch_bytes = 4 * tb * max(H1, H2) * 4
    vmem_needed = weight_bytes + 2 * tile_bytes + scratch_bytes
    vmem_limit = None
    if vmem_needed > (28 << 20):
        vmem_limit = int(min(vmem_needed + (8 << 20), 60 << 20))

    out = pl.pallas_call(
        _net_kernel,
        out_shape=jax.ShapeDtypeStruct((bp, H2), jnp.float32),
        grid=grid,
        in_specs=[
            pl.BlockSpec((tb, D), lambda i: (i, 0)),     # x tile
            pl.BlockSpec((tb, H1), lambda i: (i, 0)),    # dropout mask 1 tile
            pl.BlockSpec((tb, H2), lambda i: (i, 0)),    # dropout mask 2 tile
            pl.BlockSpec((D, H1), lambda i: (0, 0)),     # w1 (resident)
            pl.BlockSpec((1, H1), lambda i: (0, 0)),     # b1 (resident)
            pl.BlockSpec((H1, H2), lambda i: (0, 0)),    # w2 (resident)
            pl.BlockSpec((1, H2), lambda i: (0, 0)),     # b2 (resident)
        ],
        out_specs=pl.BlockSpec((tb, H2), lambda i: (i, 0)),
        compiler_params=pltpu.CompilerParams(
            dimension_semantics=("parallel",),
            vmem_limit_bytes=vmem_limit),
        cost_estimate=cost,
    )(x16, m1, m2, w1_16, b1f, w2_16, b2f)

    return out[:B]


if __name__ == "__main__":
    # Shapes implied by the module's script: X = arange(16).reshape(2, 8).
    batch, num_inputs = 2, 8
    num_hiddens1 = num_hiddens2 = 128   # lane-dense (multiple of 128); must be equal
    num_outputs = 16                    # fc3 exists in __init__ but is unused in forward()
    dropout1, dropout2 = 0.2, 0.5

    key = jax.random.PRNGKey(0)
    k1, k2, k3, k4, k5, k6, kdrop = jax.random.split(key, 7)

    # PyTorch nn.Linear-style init: weight (out, in), then transpose to (in, out)
    # for the kernel's x @ W layout.
    def linear_init(kw, kb, fan_in, fan_out):
        bound = 1.0 / (fan_in ** 0.5)
        w = jax.random.uniform(kw, (fan_out, fan_in), jnp.float32, -bound, bound)
        b = jax.random.uniform(kb, (fan_out,), jnp.float32, -bound, bound)
        return w, b

    w1_oi, b1 = linear_init(k1, k2, num_inputs, num_hiddens1)
    w2_oi, b2 = linear_init(k3, k4, num_hiddens1, num_hiddens2)
    _w3_oi, _b3 = linear_init(k5, k6, num_hiddens2, num_outputs)
    # TODO(synk): fc3 parameters are initialized to mirror __init__ but never used,
    # exactly as in the reference forward().

    w1 = w1_oi.T                        # (num_inputs, num_hiddens1)
    w2 = w2_oi.T                        # (num_hiddens1, num_hiddens2)
    b1r = b1.reshape(1, num_hiddens1)
    b2r = b2.reshape(1, num_hiddens2)

    x = jnp.arange(batch * num_inputs, dtype=jnp.float32).reshape(batch, num_inputs)

    out = net_forward(x, w1, b1r, w2, b2r, kdrop,
                      dropout1=dropout1, dropout2=dropout2, is_train=True)
    jax.block_until_ready(out)

    assert out.shape == (batch, num_hiddens2)
    assert out.dtype == jnp.float32
    assert bool(jnp.all(jnp.isfinite(out)))
    print("KERNEL_OK")
</pallas_src>

<mosaic_0001>
module attributes {stable_mosaic.version = 11 : i64} {
  func.func @_net_kernel(%arg0: i32, %arg1: memref<8x8xbf16, #tpu.memory_space<vmem>>, %arg2: memref<8x128xf32, #tpu.memory_space<vmem>>, %arg3: memref<8x128xf32, #tpu.memory_space<vmem>>, %arg4: memref<8x128xbf16, #tpu.memory_space<vmem>>, %arg5: memref<1x128xf32, #tpu.memory_space<vmem>>, %arg6: memref<128x128xbf16, #tpu.memory_space<vmem>>, %arg7: memref<1x128xf32, #tpu.memory_space<vmem>>, %arg8: memref<8x128xf32, #tpu.memory_space<vmem>>) attributes {dimension_semantics = [#tpu.dimension_semantics<parallel>], iteration_bounds = array<i64: 1>, scalar_prefetch = 0 : i64, scratch_operands = 0 : i64, tpu.core_type = #tpu.core_type<tc>, window_params = [{transform_indices = @transform_0, window_bounds = array<i64: 8, 8>}, {transform_indices = @transform_1, window_bounds = array<i64: 8, 128>}, {transform_indices = @transform_2, window_bounds = array<i64: 8, 128>}, {pipeline_mode = #tpu.pipeline_mode<synchronous>, transform_indices = @transform_3, window_bounds = array<i64: 8, 128>}, {pipeline_mode = #tpu.pipeline_mode<synchronous>, transform_indices = @transform_4, window_bounds = array<i64: 1, 128>}, {pipeline_mode = #tpu.pipeline_mode<synchronous>, transform_indices = @transform_5, window_bounds = array<i64: 128, 128>}, {pipeline_mode = #tpu.pipeline_mode<synchronous>, transform_indices = @transform_6, window_bounds = array<i64: 1, 128>}, {transform_indices = @transform_7, window_bounds = array<i64: 8, 128>}]} {
    %c0 = arith.constant 0 : index
    %c0_0 = arith.constant 0 : index
    %0 = vector.load %arg1[%c0, %c0_0] : memref<8x8xbf16, #tpu.memory_space<vmem>>, vector<8x8xbf16>
    %c0_1 = arith.constant 0 : index
    %c0_2 = arith.constant 0 : index
    %1 = vector.load %arg4[%c0_1, %c0_2] : memref<8x128xbf16, #tpu.memory_space<vmem>>, vector<8x128xbf16>
    %cst = arith.constant dense<0.000000e+00> : vector<8x128xf32>
    %2 = tpu.matmul %0, %1, %cst {dimension_numbers = #tpu.dot_dimension_numbers<[1], [0], [0], [1], [0, 0, 1, 1], [], []>} : vector<8x8xbf16>, vector<8x128xbf16>, vector<8x128xf32> -> vector<8x128xf32>
    %c0_3 = arith.constant 0 : index
    %c0_4 = arith.constant 0 : index
    %3 = vector.load %arg5[%c0_3, %c0_4] : memref<1x128xf32, #tpu.memory_space<vmem>>, vector<1x128xf32>
    %4 = vector.broadcast %3 : vector<1x128xf32> to vector<8x128xf32>
    %5 = arith.addf %2, %4 : vector<8x128xf32>
    %cst_5 = arith.constant 0.000000e+00 : f32
    %6 = vector.broadcast %cst_5 : f32 to vector<8x128xf32>
    %7 = arith.maximumf %5, %6 : vector<8x128xf32>
    %c0_6 = arith.constant 0 : index
    %c0_7 = arith.constant 0 : index
    %8 = vector.load %arg2[%c0_6, %c0_7] : memref<8x128xf32, #tpu.memory_space<vmem>>, vector<8x128xf32>
    %9 = arith.mulf %7, %8 : vector<8x128xf32>
    %10 = arith.truncf %9 : vector<8x128xf32> to vector<8x128xbf16>
    %c0_8 = arith.constant 0 : index
    %c0_9 = arith.constant 0 : index
    %11 = vector.load %arg6[%c0_8, %c0_9] : memref<128x128xbf16, #tpu.memory_space<vmem>>, vector<128x128xbf16>
    %cst_10 = arith.constant dense<0.000000e+00> : vector<8x128xf32>
    %12 = tpu.matmul %10, %11, %cst_10 {dimension_numbers = #tpu.dot_dimension_numbers<[1], [0], [0], [1], [0, 0, 1, 1], [], []>} : vector<8x128xbf16>, vector<128x128xbf16>, vector<8x128xf32> -> vector<8x128xf32>
    %c0_11 = arith.constant 0 : index
    %c0_12 = arith.constant 0 : index
    %13 = vector.load %arg7[%c0_11, %c0_12] : memref<1x128xf32, #tpu.memory_space<vmem>>, vector<1x128xf32>
    %14 = vector.broadcast %13 : vector<1x128xf32> to vector<8x128xf32>
    %15 = arith.addf %12, %14 : vector<8x128xf32>
    %cst_13 = arith.constant 0.000000e+00 : f32
    %16 = vector.broadcast %cst_13 : f32 to vector<8x128xf32>
    %17 = arith.maximumf %15, %16 : vector<8x128xf32>
    %c0_14 = arith.constant 0 : index
    %c0_15 = arith.constant 0 : index
    %18 = vector.load %arg3[%c0_14, %c0_15] : memref<8x128xf32, #tpu.memory_space<vmem>>, vector<8x128xf32>
    %19 = arith.mulf %17, %18 : vector<8x128xf32>
    %20 = arith.truncf %19 : vector<8x128xf32> to vector<8x128xbf16>
    %c0_16 = arith.constant 0 : index
    %c0_17 = arith.constant 0 : index
    %21 = vector.load %arg6[%c0_16, %c0_17] : memref<128x128xbf16, #tpu.memory_space<vmem>>, vector<128x128xbf16>
    %cst_18 = arith.constant dense<0.000000e+00> : vector<8x128xf32>
    %22 = tpu.matmul %20, %21, %cst_18 {dimension_numbers = #tpu.dot_dimension_numbers<[1], [0], [0], [1], [0, 0, 1, 1], [], []>} : vector<8x128xbf16>, vector<128x128xbf16>, vector<8x128xf32> -> vector<8x128xf32>
    %c0_19 = arith.constant 0 : index
    %c0_20 = arith.constant 0 : index
    %23 = vector.load %arg7[%c0_19, %c0_20] : memref<1x128xf32, #tpu.memory_space<vmem>>, vector<1x128xf32>
    %24 = vector.broadcast %23 : vector<1x128xf32> to vector<8x128xf32>
    %25 = arith.addf %22, %24 : vector<8x128xf32>
    %cst_21 = arith.constant 0.000000e+00 : f32
    %26 = vector.broadcast %cst_21 : f32 to vector<8x128xf32>
    %27 = arith.maximumf %25, %26 : vector<8x128xf32>
    %c0_22 = arith.constant 0 : index
    %c0_23 = arith.constant 0 : index
    %28 = vector.load %arg8[%c0_22, %c0_23] : memref<8x128xf32, #tpu.memory_space<vmem>>, vector<8x128xf32>
    tpu.vector_store %arg8[%c0_22, %c0_23], %27 {strides = array<i32>} : memref<8x128xf32, #tpu.memory_space<vmem>>, vector<8x128xf32>,
    return
  }
  func.func @transform_0(%arg0: i32) -> (i32, i32) {
    %c0_i32 = arith.constant 0 : i32
    %c0_i32_0 = arith.constant 0 : i32
    return %arg0, %c0_i32 : i32, i32
  }
  func.func @transform_1(%arg0: i32) -> (i32, i32) {
    %c0_i32 = arith.constant 0 : i32
    %c0_i32_0 = arith.constant 0 : i32
    return %arg0, %c0_i32 : i32, i32
  }
  func.func @transform_2(%arg0: i32) -> (i32, i32) {
    %c0_i32 = arith.constant 0 : i32
    %c0_i32_0 = arith.constant 0 : i32
    return %arg0, %c0_i32 : i32, i32
  }
  func.func @transform_3(%arg0: i32) -> (i32, i32) {
    %c0_i32 = arith.constant 0 : i32
    %c0_i32_0 = arith.constant 0 : i32
    %c0_i32_1 = arith.constant 0 : i32
    return %c0_i32, %c0_i32_0 : i32, i32
  }
  func.func @transform_4(%arg0: i32) -> (i32, i32) {
    %c0_i32 = arith.constant 0 : i32
    %c0_i32_0 = arith.constant 0 : i32
    %c0_i32_1 = arith.constant 0 : i32
    return %c0_i32, %c0_i32_0 : i32, i32
  }
  func.func @transform_5(%arg0: i32) -> (i32, i32) {
    %c0_i32 = arith.constant 0 : i32
    %c0_i32_0 = arith.constant 0 : i32
    %c0_i32_1 = arith.constant 0 : i32
    return %c0_i32, %c0_i32_0 : i32, i32
  }
  func.func @transform_6(%arg0: i32) -> (i32, i32) {
    %c0_i32 = arith.constant 0 : i32
    %c0_i32_0 = arith.constant 0 : i32
    %c0_i32_1 = arith.constant 0 : i32
    return %c0_i32, %c0_i32_0 : i32, i32
  }
  func.func @transform_7(%arg0: i32) -> (i32, i32) {
    %c0_i32 = arith.constant 0 : i32
    %c0_i32_0 = arith.constant 0 : i32
    return %arg0, %c0_i32 : i32, i32
  }
}

</mosaic_0001>

<bundles_post_ra>
// kernel: net_forward.3
= control target key start
LH: loop header
LB: loop body
LE: loop exit
PB: predicated region body
PF: predicated region fallthrough
CT: control target
= control target key end

     0   :  { %vm37_vm0 = vcmask 1043456   ;;  %vm33_vm1 = vcmask 64512   ;;  %s290_s3 = inlined_call_operand.vmem [shape: bf16[8,128], index: 3, kind: input, shape index: {}]   ;;  %s291_s0 = inlined_call_operand.vmem [shape: bf16[8,8], index: 0, kind: input, shape index: {}]   ;;  %s292_s5 = inlined_call_operand.vmem [shape: bf16[128,128], index: 5, kind: input, shape index: {}]   ;;  %s293_s4 = inlined_call_operand.vmem [shape: f32[1,128], index: 4, kind: input, shape index: {}]   ;;  %s294_s6 = inlined_call_operand.vmem [shape: f32[1,128], index: 6, kind: input, shape index: {}]   ;;  %s295_s1 = inlined_call_operand.vmem [shape: f32[8,128], index: 1, kind: input, shape index: {}]   ;;  %s296_s2 = inlined_call_operand.vmem [shape: f32[8,128], index: 2, kind: input, shape index: {}]   ;;  %s297_s7 = inlined_call_operand.vmem [shape: f32[8,128], index: 7, kind: output, shape index: {}]  }
   0x1   :  { %v28_v0 = vld [vmem:[%s290_s3] sm:$0xf]  ;;  %v202_v1 = vld [vmem:[%s292_s5 + $0x38] sm:$0xff]  ;;  %v201_v4 = vld [vmem:[%s292_s5 + $0x30] sm:$0xff] }
   0x2   :  { %v39_v2 = vsel %vm37_vm0, %v28_v0, 0  ;;  %v27_v3 = vld [vmem:[%s291_s0] sm:$0xf]  ;;  %126 = vmatpush.bf16.msra.mxu1 %v202_v1  ;;  %143 = vmatpush.bf16.msra.mxu2 %v202_v1  ;;  %v200_v5 = vld [vmem:[%s292_s5 + $0x28] sm:$0xff]  ;;  %v198_v7 = vld [vmem:[%s292_s5 + $0x18] sm:$0xff] }
   0x3   :  { %48 = vmatpush.bf16.msra.mxu0 %v39_v2  ;;  %v199_v6 = vld [vmem:[%s292_s5 + $0x20] sm:$0xff]  ;;  %v197_v8 = vld [vmem:[%s292_s5 + $0x10] sm:$0xff]  ;;  %v196_v9 = vld [vmem:[%s292_s5 + $0x8] sm:$0xff] }
   0x4   :  { %v195_v10 = vld [vmem:[%s292_s5] sm:$0xff] }
   0x5   :  { %v203_v11 = vld [vmem:[%s293_s4] ss:$0 sm:$0xff] }
   0x6   :  { %162 = vmatmul.msk.bf16.vlgmr.msra.gmra.mxu0 %vm33_vm1, %v27_v3  ;;  %127 = vmatpush.bf16.msra.mxu1 %v201_v4  ;;  %v55_v14 = vld [vmem:[%s295_s1] sm:$0xff] }
   0x7   :  { %144 = vmatpush.bf16.msra.mxu2 %v201_v4  ;;  %v204_v19 = vld [vmem:[%s294_s6] ss:$0 sm:$0xff] }
   0x8   :  { %v140_v22 = vld [vmem:[%s296_s2] sm:$0xff] }
   0xa   :  { %128 = vmatpush.bf16.msra.mxu1 %v200_v5 }
   0xb   :  { %145 = vmatpush.bf16.msra.mxu2 %v200_v5 }
   0xe   :  { %129 = vmatpush.bf16.msra.mxu1 %v199_v6 }
   0xf   :  { %146 = vmatpush.bf16.msra.mxu2 %v199_v6 }
  0x12   :  { %130 = vmatpush.bf16.msra.mxu1 %v198_v7 }
  0x13   :  { %147 = vmatpush.bf16.msra.mxu2 %v198_v7 }
  0x16   :  { %131 = vmatpush.bf16.msra.mxu1 %v197_v8 }
  0x17   :  { %148 = vmatpush.bf16.msra.mxu2 %v197_v8 }
  0x1a   :  { %132 = vmatpush.bf16.msra.mxu1 %v196_v9 }
  0x1b   :  { %149 = vmatpush.bf16.msra.mxu2 %v196_v9 }
  0x1e   :  { %133 = vmatpush.bf16.msra.mxu1 %v195_v10 }
  0x1f   :  { %150 = vmatpush.bf16.msra.mxu2 %v195_v10 }
  0x83   :  { %v50_v12 = vpop.f32.mrf.mxu0 }
  0x84   :  { %v51_v13 = vadd.f32 %v203_v11, %v50_v12 }
  0x86   :  { %v54_v15 = vmax.f32 %v51_v13, 0.0 }
  0x88   :  { %v56_v16 = vmul.f32 %v55_v14, %v54_v15 }
  0x8a   :  { %v57_v17 = vpack.c.bf16 %v56_v16, %v56_v16 }
  0x8b   :  { %v52_v18 = vpop.f32.mrf.mxu0 }
  0x8c   :  { %134 = vmatmul.bf16.vlgmr.msra.gmra.mxu1 %v57_v17 }
 0x109   :  { %v135_v20 = vpop.f32.mrf.mxu1 }
 0x10a   :  { %v136_v21 = vadd.f32 %v204_v19, %v135_v20 }
 0x10c   :  { %v139_v23 = vmax.f32 %v136_v21, 0.0 }
 0x10e   :  { %v141_v24 = vmul.f32 %v140_v22, %v139_v23 }
 0x110   :  { %v142_v25 = vpack.c.bf16 %v141_v24, %v141_v24 }
 0x111   :  { %v137_v26 = vpop.f32.mrf.mxu1 }
 0x112   :  { %151 = vmatmul.bf16.vlgmr.msra.gmra.mxu2 %v142_v25 }
 0x195   :  { %v152_v27 = vpop.f32.mrf.mxu2 }
 0x196   :  { %v153_v28 = vadd.f32 %v204_v19, %v152_v27 }
 0x198   :  { %v156_v29 = vmax.f32 %v153_v28, 0.0 }
 0x19a   :  { %157 = vst [vmem:[%s297_s7] sm:$0xff] %v156_v29 }
 0x19d   :  { %v154_v30 = vpop.f32.mrf.mxu2 }

</bundles_post_ra>
